<compile_context>
chip_gen: v6e
topology: v6e:2x2x1
jax: 0.10.0
libtpu: 0.0.40
codegen_flags: <defaults>
</compile_context>

<pallas_src>
import math

import jax
import jax.numpy as jnp
from jax.experimental import pallas as pl
from jax.experimental.pallas import tpu as pltpu  # TPU backend (memory spaces etc.)

# ---------------- model hyper-parameters (small, consistent with the module) ----------------
B = 2          # batch
S = 8          # sequence length
D = 32         # d_model (== SublayerConnection size)
H = 4          # attention heads
DK = D // H    # per-head dim
DFF = 64       # feed-forward hidden size
EPS = 1e-6
BS = B * S     # flattened token count


def _layer_norm(x, a, b):
    # Matches the PyTorch LayerNorm in the module: unbiased std (D-1), eps added to std.
    mean = jnp.mean(x, axis=-1, keepdims=True)
    var = jnp.sum((x - mean) ** 2, axis=-1, keepdims=True) * (1.0 / (x.shape[-1] - 1))
    inv = pl.reciprocal(jnp.sqrt(var) + EPS, approx=True)   # EUP slot, ~1e-4 rel. error
    return a * (x - mean) * inv + b


def sublayer_kernel(
    x_ref, mask_ref,
    ln1_a_ref, ln1_b_ref,
    wqkv_ref, bqkv_ref, wo_ref, bo_ref,
    ln2_a_ref, ln2_b_ref,
    w1_ref, b1_ref, w2_ref, b2_ref,
    out_ref,
):
    x = x_ref[...]                                   # (B, S, D)
    x_flat = x.reshape(BS, D)                        # leading-dim merge only (no relayout)
    mask_zero = mask_ref[...] == 0.0                 # (B, S, S), hoisted out of the head loop

    # -------- sublayer 0: x + self_attn(LN1(x)) --------
    xn = _layer_norm(x_flat, ln1_a_ref[...], ln1_b_ref[...])            # (BS, D)

    # fused Q/K/V projection: one (BS, D) @ (D, 3D) matmul + one bias add
    qkv = jnp.dot(xn, wqkv_ref[...], preferred_element_type=jnp.float32) + bqkv_ref[...]
    qkv = qkv.reshape(B, S, 3 * D)
    q = qkv[:, :, 0:D]
    k = qkv[:, :, D:2 * D]
    v = qkv[:, :, 2 * D:3 * D]

    scale = 1.0 / math.sqrt(DK)
    head_outs = []
    for h in range(H):                               # static loop over heads (H = 4)
        qh = q[:, :, h * DK:(h + 1) * DK]            # (B, S, DK)
        kh = k[:, :, h * DK:(h + 1) * DK]
        vh = v[:, :, h * DK:(h + 1) * DK]
        s = jnp.einsum('bqd,bkd->bqk', qh, kh,
                       preferred_element_type=jnp.float32) * scale       # (B, S, S)
        s = jnp.where(mask_zero, -1e9, s)            # masked_fill(mask == 0, -1e9)
        s = s - jnp.max(s, axis=-1, keepdims=True)
        p = jnp.exp(s)
        p = p * pl.reciprocal(jnp.sum(p, axis=-1, keepdims=True), approx=True)
        head_outs.append(jnp.einsum('bqk,bkd->bqd', p, vh,
                                    preferred_element_type=jnp.float32))  # (B, S, DK)
    ctx = jnp.concatenate(head_outs, axis=-1).reshape(BS, D)             # (BS, D)

    attn_out = jnp.dot(ctx, wo_ref[...], preferred_element_type=jnp.float32) + bo_ref[...]
    x_flat = x_flat + attn_out                       # dropout is identity in eval mode

    # -------- sublayer 1: x + feed_forward(LN2(x)) --------
    xn2 = _layer_norm(x_flat, ln2_a_ref[...], ln2_b_ref[...])            # (BS, D)
    hmid = jnp.dot(xn2, w1_ref[...], preferred_element_type=jnp.float32) + b1_ref[...]
    hmid = jnp.maximum(hmid, 0.0)                    # ReLU
    ffn_out = jnp.dot(hmid, w2_ref[...], preferred_element_type=jnp.float32) + b2_ref[...]

    out_ref[...] = (x_flat + ffn_out).reshape(B, S, D)


def encoder_layer(x, mask, params):
    """x: [B, S, D] f32, mask: [B, S, S] f32 (1 = attend, 0 = masked)."""
    (ln1_a, ln1_b, wq, bq, wk, bk, wv, bv, wo, bo,
     ln2_a, ln2_b, w1, b1, w2, b2) = params

    # Pack Q/K/V into a single fused projection in the wrapper (pure parameter re-layout).
    wqkv = jnp.concatenate([wq, wk, wv], axis=1)     # (D, 3D)
    bqkv = jnp.concatenate([bq, bk, bv], axis=1)     # (1, 3D)

    # Single grid-less pallas_call: every operand is a whole-array VMEM block, loaded once.
    return pl.pallas_call(
        sublayer_kernel,
        out_shape=jax.ShapeDtypeStruct((B, S, D), jnp.float32),
    )(x, mask, ln1_a, ln1_b, wqkv, bqkv, wo, bo, ln2_a, ln2_b, w1, b1, w2, b2)


def init_params(key):
    """Deterministic synthetic parameters (shapes implied by the module's __init__)."""
    ks = jax.random.split(key, 8)
    scale = 0.1
    ln1_a = jnp.ones((1, D), jnp.float32)
    ln1_b = jnp.zeros((1, D), jnp.float32)
    ln2_a = jnp.ones((1, D), jnp.float32)
    ln2_b = jnp.zeros((1, D), jnp.float32)
    wq = scale * jax.random.normal(ks[0], (D, D), jnp.float32)
    wk = scale * jax.random.normal(ks[1], (D, D), jnp.float32)
    wv = scale * jax.random.normal(ks[2], (D, D), jnp.float32)
    wo = scale * jax.random.normal(ks[3], (D, D), jnp.float32)
    bq = scale * jax.random.normal(ks[4], (1, D), jnp.float32)
    bk = jnp.zeros((1, D), jnp.float32)
    bv = jnp.zeros((1, D), jnp.float32)
    bo = scale * jax.random.normal(ks[5], (1, D), jnp.float32)
    w1 = scale * jax.random.normal(ks[6], (D, DFF), jnp.float32)
    b1 = jnp.zeros((1, DFF), jnp.float32)
    w2 = scale * jax.random.normal(ks[7], (DFF, D), jnp.float32)
    b2 = jnp.zeros((1, D), jnp.float32)
    return (ln1_a, ln1_b, wq, bq, wk, bk, wv, bv, wo, bo,
            ln2_a, ln2_b, w1, b1, w2, b2)


if __name__ == "__main__":
    key = jax.random.PRNGKey(0)
    kx, kp = jax.random.split(key)
    x = jax.random.normal(kx, (B, S, D), jnp.float32)

    # mask: batch 0 attends everywhere; batch 1 masks the last two key positions.
    mask = jnp.ones((B, S, S), jnp.float32)
    mask = mask.at[1, :, S - 2:].set(0.0)

    params = init_params(kp)
    out = encoder_layer(x, mask, params)
    jax.block_until_ready(out)
    assert out.shape == (B, S, D)
    assert bool(jnp.all(jnp.isfinite(out)))
    print("KERNEL_OK")
</pallas_src>

<mosaic_0001>
module attributes {stable_mosaic.version = 11 : i64} {
  func.func @sublayer_kernel(%arg0: memref<2x8x32xf32, #tpu.memory_space<vmem>>, %arg1: memref<2x8x8xf32, #tpu.memory_space<vmem>>, %arg2: memref<1x32xf32, #tpu.memory_space<vmem>>, %arg3: memref<1x32xf32, #tpu.memory_space<vmem>>, %arg4: memref<32x96xf32, #tpu.memory_space<vmem>>, %arg5: memref<1x96xf32, #tpu.memory_space<vmem>>, %arg6: memref<32x32xf32, #tpu.memory_space<vmem>>, %arg7: memref<1x32xf32, #tpu.memory_space<vmem>>, %arg8: memref<1x32xf32, #tpu.memory_space<vmem>>, %arg9: memref<1x32xf32, #tpu.memory_space<vmem>>, %arg10: memref<32x64xf32, #tpu.memory_space<vmem>>, %arg11: memref<1x64xf32, #tpu.memory_space<vmem>>, %arg12: memref<64x32xf32, #tpu.memory_space<vmem>>, %arg13: memref<1x32xf32, #tpu.memory_space<vmem>>, %arg14: memref<2x8x32xf32, #tpu.memory_space<vmem>>) attributes {dimension_semantics = [], scalar_prefetch = 0 : i64, scratch_operands = 0 : i64, tpu.core_type = #tpu.core_type<tc>} {
    %c0 = arith.constant 0 : index
    %c0_0 = arith.constant 0 : index
    %c0_1 = arith.constant 0 : index
    %0 = vector.load %arg0[%c0, %c0_0, %c0_1] : memref<2x8x32xf32, #tpu.memory_space<vmem>>, vector<2x8x32xf32>
    %1 = vector.shape_cast %0 : vector<2x8x32xf32> to vector<16x32xf32>
    %c0_2 = arith.constant 0 : index
    %c0_3 = arith.constant 0 : index
    %c0_4 = arith.constant 0 : index
    %2 = vector.load %arg1[%c0_2, %c0_3, %c0_4] : memref<2x8x8xf32, #tpu.memory_space<vmem>>, vector<2x8x8xf32>
    %cst = arith.constant 0.000000e+00 : f32
    %3 = vector.broadcast %cst : f32 to vector<2x8x8xf32>
    %4 = arith.cmpf oeq, %2, %3 : vector<2x8x8xf32>
    %c0_5 = arith.constant 0 : index
    %c0_6 = arith.constant 0 : index
    %5 = vector.load %arg2[%c0_5, %c0_6] : memref<1x32xf32, #tpu.memory_space<vmem>>, vector<1x32xf32>
    %c0_7 = arith.constant 0 : index
    %c0_8 = arith.constant 0 : index
    %6 = vector.load %arg3[%c0_7, %c0_8] : memref<1x32xf32, #tpu.memory_space<vmem>>, vector<1x32xf32>
    %cst_9 = arith.constant dense<0.000000e+00> : vector<16xf32>
    %7 = vector.multi_reduction <add>, %1, %cst_9 [1] : vector<16x32xf32> to vector<16xf32>
    %8 = vector.shape_cast %7 : vector<16xf32> to vector<16x1xf32>
    %cst_10 = arith.constant 3.200000e+01 : f32
    %9 = vector.broadcast %cst_10 : f32 to vector<16x1xf32>
    %10 = arith.divf %8, %9 : vector<16x1xf32>
    %11 = vector.broadcast %10 : vector<16x1xf32> to vector<16x32xf32>
    %12 = arith.subf %1, %11 : vector<16x32xf32>
    %13 = arith.mulf %12, %12 : vector<16x32xf32>
    %cst_11 = arith.constant dense<0.000000e+00> : vector<16xf32>
    %14 = vector.multi_reduction <add>, %13, %cst_11 [1] : vector<16x32xf32> to vector<16xf32>
    %15 = vector.shape_cast %14 : vector<16xf32> to vector<16x1xf32>
    %cst_12 = arith.constant 0.0322580636 : f32
    %16 = vector.broadcast %cst_12 : f32 to vector<16x1xf32>
    %17 = arith.mulf %15, %16 : vector<16x1xf32>
    %18 = math.sqrt %17 : vector<16x1xf32>
    %cst_13 = arith.constant 9.99999997E-7 : f32
    %19 = vector.broadcast %cst_13 : f32 to vector<16x1xf32>
    %20 = arith.addf %18, %19 : vector<16x1xf32>
    %21 = tpu.reciprocal %20 {approx = true} : vector<16x1xf32> -> vector<16x1xf32>
    %22 = vector.broadcast %10 : vector<16x1xf32> to vector<16x32xf32>
    %23 = arith.subf %1, %22 : vector<16x32xf32>
    %24 = vector.broadcast %5 : vector<1x32xf32> to vector<16x32xf32>
    %25 = arith.mulf %24, %23 : vector<16x32xf32>
    %26 = vector.broadcast %21 : vector<16x1xf32> to vector<16x32xf32>
    %27 = arith.mulf %25, %26 : vector<16x32xf32>
    %28 = vector.broadcast %6 : vector<1x32xf32> to vector<16x32xf32>
    %29 = arith.addf %27, %28 : vector<16x32xf32>
    %c0_14 = arith.constant 0 : index
    %c0_15 = arith.constant 0 : index
    %30 = vector.load %arg4[%c0_14, %c0_15] : memref<32x96xf32, #tpu.memory_space<vmem>>, vector<32x96xf32>
    %cst_16 = arith.constant dense<0.000000e+00> : vector<16x96xf32>
    %31 = tpu.matmul %29, %30, %cst_16 {dimension_numbers = #tpu.dot_dimension_numbers<[1], [0], [0], [1], [0, 0, 1, 1], [], []>} : vector<16x32xf32>, vector<32x96xf32>, vector<16x96xf32> -> vector<16x96xf32>
    %c0_17 = arith.constant 0 : index
    %c0_18 = arith.constant 0 : index
    %32 = vector.load %arg5[%c0_17, %c0_18] : memref<1x96xf32, #tpu.memory_space<vmem>>, vector<1x96xf32>
    %33 = vector.broadcast %32 : vector<1x96xf32> to vector<16x96xf32>
    %34 = arith.addf %31, %33 : vector<16x96xf32>
    %35 = vector.shape_cast %34 : vector<16x96xf32> to vector<2x8x96xf32>
    %36 = vector.extract_strided_slice %35 {offsets = [0, 0, 0], sizes = [2, 8, 32], strides = [1, 1, 1]} : vector<2x8x96xf32> to vector<2x8x32xf32>
    %37 = vector.extract_strided_slice %35 {offsets = [0, 0, 32], sizes = [2, 8, 32], strides = [1, 1, 1]} : vector<2x8x96xf32> to vector<2x8x32xf32>
    %38 = vector.extract_strided_slice %35 {offsets = [0, 0, 64], sizes = [2, 8, 32], strides = [1, 1, 1]} : vector<2x8x96xf32> to vector<2x8x32xf32>
    %39 = vector.extract_strided_slice %36 {offsets = [0, 0, 0], sizes = [2, 8, 8], strides = [1, 1, 1]} : vector<2x8x32xf32> to vector<2x8x8xf32>
    %40 = vector.extract_strided_slice %37 {offsets = [0, 0, 0], sizes = [2, 8, 8], strides = [1, 1, 1]} : vector<2x8x32xf32> to vector<2x8x8xf32>
    %41 = vector.extract_strided_slice %38 {offsets = [0, 0, 0], sizes = [2, 8, 8], strides = [1, 1, 1]} : vector<2x8x32xf32> to vector<2x8x8xf32>
    "tpu.trace_start"() <{level = 10 : i32, message = "bqd,bkd->bqk"}> : () -> ()
    %cst_19 = arith.constant dense<0.000000e+00> : vector<2x8x8xf32>
    %42 = tpu.matmul %39, %40, %cst_19 {dimension_numbers = #tpu.dot_dimension_numbers<[2], [2], [1], [1], [0, 0, 0, 1, 1, 1], [0], [0]>} : vector<2x8x8xf32>, vector<2x8x8xf32>, vector<2x8x8xf32> -> vector<2x8x8xf32>
    "tpu.trace_stop"() : () -> ()
    %cst_20 = arith.constant 0.353553385 : f32
    %43 = vector.broadcast %cst_20 : f32 to vector<2x8x8xf32>
    %44 = arith.mulf %42, %43 : vector<2x8x8xf32>
    %cst_21 = arith.constant -1.000000e+09 : f32
    %45 = vector.broadcast %cst_21 : f32 to vector<2x8x8xf32>
    %46 = arith.select %4, %45, %44 : vector<2x8x8xi1>, vector<2x8x8xf32>
    %cst_22 = arith.constant dense<0xFF800000> : vector<2x8xf32>
    %47 = vector.multi_reduction <maximumf>, %46, %cst_22 [2] : vector<2x8x8xf32> to vector<2x8xf32>
    %48 = vector.shape_cast %47 : vector<2x8xf32> to vector<2x8x1xf32>
    %49 = vector.broadcast %48 : vector<2x8x1xf32> to vector<2x8x8xf32>
    %50 = arith.subf %46, %49 : vector<2x8x8xf32>
    %51 = math.exp %50 : vector<2x8x8xf32>
    %cst_23 = arith.constant dense<0.000000e+00> : vector<2x8xf32>
    %52 = vector.multi_reduction <add>, %51, %cst_23 [2] : vector<2x8x8xf32> to vector<2x8xf32>
    %53 = vector.shape_cast %52 : vector<2x8xf32> to vector<2x8x1xf32>
    %54 = tpu.reciprocal %53 {approx = true} : vector<2x8x1xf32> -> vector<2x8x1xf32>
    %55 = vector.broadcast %54 : vector<2x8x1xf32> to vector<2x8x8xf32>
    %56 = arith.mulf %51, %55 : vector<2x8x8xf32>
    "tpu.trace_start"() <{level = 10 : i32, message = "bqk,bkd->bqd"}> : () -> ()
    %cst_24 = arith.constant dense<0.000000e+00> : vector<2x8x8xf32>
    %57 = tpu.matmul %56, %41, %cst_24 {dimension_numbers = #tpu.dot_dimension_numbers<[2], [1], [1], [2], [0, 0, 0, 1, 1, 2], [0], [0]>} : vector<2x8x8xf32>, vector<2x8x8xf32>, vector<2x8x8xf32> -> vector<2x8x8xf32>
    "tpu.trace_stop"() : () -> ()
    %58 = vector.extract_strided_slice %36 {offsets = [0, 0, 8], sizes = [2, 8, 8], strides = [1, 1, 1]} : vector<2x8x32xf32> to vector<2x8x8xf32>
    %59 = vector.extract_strided_slice %37 {offsets = [0, 0, 8], sizes = [2, 8, 8], strides = [1, 1, 1]} : vector<2x8x32xf32> to vector<2x8x8xf32>
    %60 = vector.extract_strided_slice %38 {offsets = [0, 0, 8], sizes = [2, 8, 8], strides = [1, 1, 1]} : vector<2x8x32xf32> to vector<2x8x8xf32>
    "tpu.trace_start"() <{level = 10 : i32, message = "bqd,bkd->bqk"}> : () -> ()
    %cst_25 = arith.constant dense<0.000000e+00> : vector<2x8x8xf32>
    %61 = tpu.matmul %58, %59, %cst_25 {dimension_numbers = #tpu.dot_dimension_numbers<[2], [2], [1], [1], [0, 0, 0, 1, 1, 1], [0], [0]>} : vector<2x8x8xf32>, vector<2x8x8xf32>, vector<2x8x8xf32> -> vector<2x8x8xf32>
    "tpu.trace_stop"() : () -> ()
    %cst_26 = arith.constant 0.353553385 : f32
    %62 = vector.broadcast %cst_26 : f32 to vector<2x8x8xf32>
    %63 = arith.mulf %61, %62 : vector<2x8x8xf32>
    %cst_27 = arith.constant -1.000000e+09 : f32
    %64 = vector.broadcast %cst_27 : f32 to vector<2x8x8xf32>
    %65 = arith.select %4, %64, %63 : vector<2x8x8xi1>, vector<2x8x8xf32>
    %cst_28 = arith.constant dense<0xFF800000> : vector<2x8xf32>
    %66 = vector.multi_reduction <maximumf>, %65, %cst_28 [2] : vector<2x8x8xf32> to vector<2x8xf32>
    %67 = vector.shape_cast %66 : vector<2x8xf32> to vector<2x8x1xf32>
    %68 = vector.broadcast %67 : vector<2x8x1xf32> to vector<2x8x8xf32>
    %69 = arith.subf %65, %68 : vector<2x8x8xf32>
    %70 = math.exp %69 : vector<2x8x8xf32>
    %cst_29 = arith.constant dense<0.000000e+00> : vector<2x8xf32>
    %71 = vector.multi_reduction <add>, %70, %cst_29 [2] : vector<2x8x8xf32> to vector<2x8xf32>
    %72 = vector.shape_cast %71 : vector<2x8xf32> to vector<2x8x1xf32>
    %73 = tpu.reciprocal %72 {approx = true} : vector<2x8x1xf32> -> vector<2x8x1xf32>
    %74 = vector.broadcast %73 : vector<2x8x1xf32> to vector<2x8x8xf32>
    %75 = arith.mulf %70, %74 : vector<2x8x8xf32>
    "tpu.trace_start"() <{level = 10 : i32, message = "bqk,bkd->bqd"}> : () -> ()
    %cst_30 = arith.constant dense<0.000000e+00> : vector<2x8x8xf32>
    %76 = tpu.matmul %75, %60, %cst_30 {dimension_numbers = #tpu.dot_dimension_numbers<[2], [1], [1], [2], [0, 0, 0, 1, 1, 2], [0], [0]>} : vector<2x8x8xf32>, vector<2x8x8xf32>, vector<2x8x8xf32> -> vector<2x8x8xf32>
    "tpu.trace_stop"() : () -> ()
    %77 = vector.extract_strided_slice %36 {offsets = [0, 0, 16], sizes = [2, 8, 8], strides = [1, 1, 1]} : vector<2x8x32xf32> to vector<2x8x8xf32>
    %78 = vector.extract_strided_slice %37 {offsets = [0, 0, 16], sizes = [2, 8, 8], strides = [1, 1, 1]} : vector<2x8x32xf32> to vector<2x8x8xf32>
    %79 = vector.extract_strided_slice %38 {offsets = [0, 0, 16], sizes = [2, 8, 8], strides = [1, 1, 1]} : vector<2x8x32xf32> to vector<2x8x8xf32>
    "tpu.trace_start"() <{level = 10 : i32, message = "bqd,bkd->bqk"}> : () -> ()
    %cst_31 = arith.constant dense<0.000000e+00> : vector<2x8x8xf32>
    %80 = tpu.matmul %77, %78, %cst_31 {dimension_numbers = #tpu.dot_dimension_numbers<[2], [2], [1], [1], [0, 0, 0, 1, 1, 1], [0], [0]>} : vector<2x8x8xf32>, vector<2x8x8xf32>, vector<2x8x8xf32> -> vector<2x8x8xf32>
    "tpu.trace_stop"() : () -> ()
    %cst_32 = arith.constant 0.353553385 : f32
    %81 = vector.broadcast %cst_32 : f32 to vector<2x8x8xf32>
    %82 = arith.mulf %80, %81 : vector<2x8x8xf32>
    %cst_33 = arith.constant -1.000000e+09 : f32
    %83 = vector.broadcast %cst_33 : f32 to vector<2x8x8xf32>
    %84 = arith.select %4, %83, %82 : vector<2x8x8xi1>, vector<2x8x8xf32>
    %cst_34 = arith.constant dense<0xFF800000> : vector<2x8xf32>
    %85 = vector.multi_reduction <maximumf>, %84, %cst_34 [2] : vector<2x8x8xf32> to vector<2x8xf32>
    %86 = vector.shape_cast %85 : vector<2x8xf32> to vector<2x8x1xf32>
    %87 = vector.broadcast %86 : vector<2x8x1xf32> to vector<2x8x8xf32>
    %88 = arith.subf %84, %87 : vector<2x8x8xf32>
    %89 = math.exp %88 : vector<2x8x8xf32>
    %cst_35 = arith.constant dense<0.000000e+00> : vector<2x8xf32>
    %90 = vector.multi_reduction <add>, %89, %cst_35 [2] : vector<2x8x8xf32> to vector<2x8xf32>
    %91 = vector.shape_cast %90 : vector<2x8xf32> to vector<2x8x1xf32>
    %92 = tpu.reciprocal %91 {approx = true} : vector<2x8x1xf32> -> vector<2x8x1xf32>
    %93 = vector.broadcast %92 : vector<2x8x1xf32> to vector<2x8x8xf32>
    %94 = arith.mulf %89, %93 : vector<2x8x8xf32>
    "tpu.trace_start"() <{level = 10 : i32, message = "bqk,bkd->bqd"}> : () -> ()
    %cst_36 = arith.constant dense<0.000000e+00> : vector<2x8x8xf32>
    %95 = tpu.matmul %94, %79, %cst_36 {dimension_numbers = #tpu.dot_dimension_numbers<[2], [1], [1], [2], [0, 0, 0, 1, 1, 2], [0], [0]>} : vector<2x8x8xf32>, vector<2x8x8xf32>, vector<2x8x8xf32> -> vector<2x8x8xf32>
    "tpu.trace_stop"() : () -> ()
    %96 = vector.extract_strided_slice %36 {offsets = [0, 0, 24], sizes = [2, 8, 8], strides = [1, 1, 1]} : vector<2x8x32xf32> to vector<2x8x8xf32>
    %97 = vector.extract_strided_slice %37 {offsets = [0, 0, 24], sizes = [2, 8, 8], strides = [1, 1, 1]} : vector<2x8x32xf32> to vector<2x8x8xf32>
    %98 = vector.extract_strided_slice %38 {offsets = [0, 0, 24], sizes = [2, 8, 8], strides = [1, 1, 1]} : vector<2x8x32xf32> to vector<2x8x8xf32>
    "tpu.trace_start"() <{level = 10 : i32, message = "bqd,bkd->bqk"}> : () -> ()
    %cst_37 = arith.constant dense<0.000000e+00> : vector<2x8x8xf32>
    %99 = tpu.matmul %96, %97, %cst_37 {dimension_numbers = #tpu.dot_dimension_numbers<[2], [2], [1], [1], [0, 0, 0, 1, 1, 1], [0], [0]>} : vector<2x8x8xf32>, vector<2x8x8xf32>, vector<2x8x8xf32> -> vector<2x8x8xf32>
    "tpu.trace_stop"() : () -> ()
    %cst_38 = arith.constant 0.353553385 : f32
    %100 = vector.broadcast %cst_38 : f32 to vector<2x8x8xf32>
    %101 = arith.mulf %99, %100 : vector<2x8x8xf32>
    %cst_39 = arith.constant -1.000000e+09 : f32
    %102 = vector.broadcast %cst_39 : f32 to vector<2x8x8xf32>
    %103 = arith.select %4, %102, %101 : vector<2x8x8xi1>, vector<2x8x8xf32>
    %cst_40 = arith.constant dense<0xFF800000> : vector<2x8xf32>
    %104 = vector.multi_reduction <maximumf>, %103, %cst_40 [2] : vector<2x8x8xf32> to vector<2x8xf32>
    %105 = vector.shape_cast %104 : vector<2x8xf32> to vector<2x8x1xf32>
    %106 = vector.broadcast %105 : vector<2x8x1xf32> to vector<2x8x8xf32>
    %107 = arith.subf %103, %106 : vector<2x8x8xf32>
    %108 = math.exp %107 : vector<2x8x8xf32>
    %cst_41 = arith.constant dense<0.000000e+00> : vector<2x8xf32>
    %109 = vector.multi_reduction <add>, %108, %cst_41 [2] : vector<2x8x8xf32> to vector<2x8xf32>
    %110 = vector.shape_cast %109 : vector<2x8xf32> to vector<2x8x1xf32>
    %111 = tpu.reciprocal %110 {approx = true} : vector<2x8x1xf32> -> vector<2x8x1xf32>
    %112 = vector.broadcast %111 : vector<2x8x1xf32> to vector<2x8x8xf32>
    %113 = arith.mulf %108, %112 : vector<2x8x8xf32>
    "tpu.trace_start"() <{level = 10 : i32, message = "bqk,bkd->bqd"}> : () -> ()
    %cst_42 = arith.constant dense<0.000000e+00> : vector<2x8x8xf32>
    %114 = tpu.matmul %113, %98, %cst_42 {dimension_numbers = #tpu.dot_dimension_numbers<[2], [1], [1], [2], [0, 0, 0, 1, 1, 2], [0], [0]>} : vector<2x8x8xf32>, vector<2x8x8xf32>, vector<2x8x8xf32> -> vector<2x8x8xf32>
    "tpu.trace_stop"() : () -> ()
    %115 = tpu.concatenate %57, %76, %95, %114 in 2 : vector<2x8x8xf32>, vector<2x8x8xf32>, vector<2x8x8xf32>, vector<2x8x8xf32> -> vector<2x8x32xf32>
    %116 = vector.shape_cast %115 : vector<2x8x32xf32> to vector<16x32xf32>
    %c0_43 = arith.constant 0 : index
    %c0_44 = arith.constant 0 : index
    %117 = vector.load %arg6[%c0_43, %c0_44] : memref<32x32xf32, #tpu.memory_space<vmem>>, vector<32x32xf32>
    %cst_45 = arith.constant dense<0.000000e+00> : vector<16x32xf32>
    %118 = tpu.matmul %116, %117, %cst_45 {dimension_numbers = #tpu.dot_dimension_numbers<[1], [0], [0], [1], [0, 0, 1, 1], [], []>} : vector<16x32xf32>, vector<32x32xf32>, vector<16x32xf32> -> vector<16x32xf32>
    %c0_46 = arith.constant 0 : index
    %c0_47 = arith.constant 0 : index
    %119 = vector.load %arg7[%c0_46, %c0_47] : memref<1x32xf32, #tpu.memory_space<vmem>>, vector<1x32xf32>
    %120 = vector.broadcast %119 : vector<1x32xf32> to vector<16x32xf32>
    %121 = arith.addf %118, %120 : vector<16x32xf32>
    %122 = arith.addf %1, %121 : vector<16x32xf32>
    %c0_48 = arith.constant 0 : index
    %c0_49 = arith.constant 0 : index
    %123 = vector.load %arg8[%c0_48, %c0_49] : memref<1x32xf32, #tpu.memory_space<vmem>>, vector<1x32xf32>
    %c0_50 = arith.constant 0 : index
    %c0_51 = arith.constant 0 : index
    %124 = vector.load %arg9[%c0_50, %c0_51] : memref<1x32xf32, #tpu.memory_space<vmem>>, vector<1x32xf32>
    %cst_52 = arith.constant dense<0.000000e+00> : vector<16xf32>
    %125 = vector.multi_reduction <add>, %122, %cst_52 [1] : vector<16x32xf32> to vector<16xf32>
    %126 = vector.shape_cast %125 : vector<16xf32> to vector<16x1xf32>
    %cst_53 = arith.constant 3.200000e+01 : f32
    %127 = vector.broadcast %cst_53 : f32 to vector<16x1xf32>
    %128 = arith.divf %126, %127 : vector<16x1xf32>
    %129 = vector.broadcast %128 : vector<16x1xf32> to vector<16x32xf32>
    %130 = arith.subf %122, %129 : vector<16x32xf32>
    %131 = arith.mulf %130, %130 : vector<16x32xf32>
    %cst_54 = arith.constant dense<0.000000e+00> : vector<16xf32>
    %132 = vector.multi_reduction <add>, %131, %cst_54 [1] : vector<16x32xf32> to vector<16xf32>
    %133 = vector.shape_cast %132 : vector<16xf32> to vector<16x1xf32>
    %cst_55 = arith.constant 0.0322580636 : f32
    %134 = vector.broadcast %cst_55 : f32 to vector<16x1xf32>
    %135 = arith.mulf %133, %134 : vector<16x1xf32>
    %136 = math.sqrt %135 : vector<16x1xf32>
    %cst_56 = arith.constant 9.99999997E-7 : f32
    %137 = vector.broadcast %cst_56 : f32 to vector<16x1xf32>
    %138 = arith.addf %136, %137 : vector<16x1xf32>
    %139 = tpu.reciprocal %138 {approx = true} : vector<16x1xf32> -> vector<16x1xf32>
    %140 = vector.broadcast %128 : vector<16x1xf32> to vector<16x32xf32>
    %141 = arith.subf %122, %140 : vector<16x32xf32>
    %142 = vector.broadcast %123 : vector<1x32xf32> to vector<16x32xf32>
    %143 = arith.mulf %142, %141 : vector<16x32xf32>
    %144 = vector.broadcast %139 : vector<16x1xf32> to vector<16x32xf32>
    %145 = arith.mulf %143, %144 : vector<16x32xf32>
    %146 = vector.broadcast %124 : vector<1x32xf32> to vector<16x32xf32>
    %147 = arith.addf %145, %146 : vector<16x32xf32>
    %c0_57 = arith.constant 0 : index
    %c0_58 = arith.constant 0 : index
    %148 = vector.load %arg10[%c0_57, %c0_58] : memref<32x64xf32, #tpu.memory_space<vmem>>, vector<32x64xf32>
    %cst_59 = arith.constant dense<0.000000e+00> : vector<16x64xf32>
    %149 = tpu.matmul %147, %148, %cst_59 {dimension_numbers = #tpu.dot_dimension_numbers<[1], [0], [0], [1], [0, 0, 1, 1], [], []>} : vector<16x32xf32>, vector<32x64xf32>, vector<16x64xf32> -> vector<16x64xf32>
    %c0_60 = arith.constant 0 : index
    %c0_61 = arith.constant 0 : index
    %150 = vector.load %arg11[%c0_60, %c0_61] : memref<1x64xf32, #tpu.memory_space<vmem>>, vector<1x64xf32>
    %151 = vector.broadcast %150 : vector<1x64xf32> to vector<16x64xf32>
    %152 = arith.addf %149, %151 : vector<16x64xf32>
    %cst_62 = arith.constant 0.000000e+00 : f32
    %153 = vector.broadcast %cst_62 : f32 to vector<16x64xf32>
    %154 = arith.maximumf %152, %153 : vector<16x64xf32>
    %c0_63 = arith.constant 0 : index
    %c0_64 = arith.constant 0 : index
    %155 = vector.load %arg12[%c0_63, %c0_64] : memref<64x32xf32, #tpu.memory_space<vmem>>, vector<64x32xf32>
    %cst_65 = arith.constant dense<0.000000e+00> : vector<16x32xf32>
    %156 = tpu.matmul %154, %155, %cst_65 {dimension_numbers = #tpu.dot_dimension_numbers<[1], [0], [0], [1], [0, 0, 1, 1], [], []>} : vector<16x64xf32>, vector<64x32xf32>, vector<16x32xf32> -> vector<16x32xf32>
    %c0_66 = arith.constant 0 : index
    %c0_67 = arith.constant 0 : index
    %157 = vector.load %arg13[%c0_66, %c0_67] : memref<1x32xf32, #tpu.memory_space<vmem>>, vector<1x32xf32>
    %158 = vector.broadcast %157 : vector<1x32xf32> to vector<16x32xf32>
    %159 = arith.addf %156, %158 : vector<16x32xf32>
    %160 = arith.addf %122, %159 : vector<16x32xf32>
    %161 = vector.shape_cast %160 : vector<16x32xf32> to vector<2x8x32xf32>
    %c0_68 = arith.constant 0 : index
    %c0_69 = arith.constant 0 : index
    %c0_70 = arith.constant 0 : index
    %162 = vector.load %arg14[%c0_68, %c0_69, %c0_70] : memref<2x8x32xf32, #tpu.memory_space<vmem>>, vector<2x8x32xf32>
    tpu.vector_store %arg14[%c0_68, %c0_69, %c0_70], %161 {strides = array<i32>} : memref<2x8x32xf32, #tpu.memory_space<vmem>>, vector<2x8x32xf32>,
    return
  }
}

</mosaic_0001>

<bundles_post_ra>
// kernel: tpu_custom_call.1
= control target key start
LH: loop header
LB: loop body
LE: loop exit
PB: predicated region body
PF: predicated region fallthrough
CT: control target
= control target key end

     0   :  { %19 = vsyncpa [#allocation3], 0  ;;  %s2719_s0 = inlined_call_operand.hbm [shape: f32[2,8,32], index: 0, kind: input, shape index: {}]   ;;  %s2720_s1 = inlined_call_operand.hbm [shape: f32[2,8,8], index: 1, kind: input, shape index: {}]   ;;  %s2721_s2 = inlined_call_operand.vmem [shape: f32[1,32], index: 2, kind: input, shape index: {}]   ;;  %s2722_s3 = inlined_call_operand.vmem [shape: f32[1,32], index: 3, kind: input, shape index: {}]   ;;  %s2723_s4 = inlined_call_operand.vmem [shape: f32[32,96], index: 4, kind: input, shape index: {}]   ;;  %s2724_s5 = inlined_call_operand.vmem [shape: f32[1,96], index: 5, kind: input, shape index: {}]   ;;  %s2725_s6 = inlined_call_operand.vmem [shape: f32[32,32], index: 6, kind: input, shape index: {}]   ;;  %s2726_s7 = inlined_call_operand.vmem [shape: f32[1,32], index: 7, kind: input, shape index: {}]   ;;  %s2727_s8 = inlined_call_operand.vmem [shape: f32[1,32], index: 8, kind: input, shape index: {}]   ;;  %s2728_s9 = inlined_call_operand.vmem [shape: f32[1,32], index: 9, kind: input, shape index: {}]   ;;  %s2729_s10 = inlined_call_operand.vmem [shape: f32[32,64], index: 10, kind: input, shape index: {}]   ;;  %s2730_s11 = inlined_call_operand.vmem [shape: f32[1,64], index: 11, kind: input, shape index: {}]   ;;  %s2731_s12 = inlined_call_operand.vmem [shape: f32[64,32], index: 12, kind: input, shape index: {}]   ;;  %s2732_s13 = inlined_call_operand.vmem [shape: f32[1,32], index: 13, kind: input, shape index: {}]   ;;  %s2733_s14 = inlined_call_operand.hbm [shape: f32[2,8,32], index: 14, kind: output, shape index: {}]  }
   0x1   :  { %20 = vsyncpa [#allocation6], 0 }
   0x2   :  { %21 = vsyncpa [#allocation4], 0  ;;  %s2332_s29 = smov [#allocation2]  }
   0x3   :  { %s27_s30 = sshll.u32 %s2332_s29, 4  ;;  %s28_s30 = int_to_ptr.vmem [resolvable:$true] %s27_s30 }
   0x4   :  { %s2274_s15 = scalar_lea.vmem %s28_s30, 256  ;;  %p2279_p1 = scmp.lt.s32.totalorder %s28_s30, %s28_s30 }
   0x5   :  { %p2275_p0 = scmp.ne.s32.totalorder %s28_s30, %s2274_s15  ;;  %p2280_p2 = scmp.lt.s32.totalorder %s2274_s15, %s2274_s15 }
   0x7   :  { %p2281_p3 = por %p2280_p2, %p2279_p1 }
   0x9   :  { %p2282_p4 = pnand %p2281_p3, %p2275_p0 }
   0xb   :  { %2285 = shalt.err (!%p2282_p4)
}
   0xc   :  { %s2333_s16 = smov 128   ;;  %s2334_s17 = smov 8  }
   0xd   :  { %33 = dma.hbm_to_vmem [thread:$0]  %s2719_s0, 256, %s28_s30, [#allocation3], %s2333_s16, %s2333_s16, %s2334_s17  }
   0xe   :  { %s2335_s20 = smov [#allocation5]  }
   0xf   :  { %s39_s21 = sshll.u32 %s2335_s20, 4  ;;  %s40_s21 = int_to_ptr.vmem [resolvable:$true] %s39_s21 }
  0x10   :  { %s2294_s22 = scalar_lea.vmem %s40_s21, 256  ;;  %p2299_p6 = scmp.lt.s32.totalorder %s40_s21, %s40_s21 }
  0x11   :  { %p2295_p5 = scmp.ne.s32.totalorder %s40_s21, %s2294_s22  ;;  %p2300_p7 = scmp.lt.s32.totalorder %s2294_s22, %s2294_s22 }
  0x13   :  { %p2301_p8 = por %p2300_p7, %p2299_p6 }
  0x15   :  { %p2302_p9 = pnand %p2301_p8, %p2295_p5 }
  0x17   :  { %2305 = shalt.err (!%p2302_p9)
}
  0x18   :  { %45 = dma.hbm_to_vmem [thread:$0]  %s2720_s1, 256, %s40_s21, [#allocation6], %s2333_s16, %s2333_s16, %s2334_s17  }
  0x19   :  { %2326 = dma.done.wait [#allocation3], 256  }
  0x1a   :  { %2327 = vsyncadd [#allocation3], 4294967040 }
  0x1b   :  { %2328 = dma.done.wait [#allocation6], 256  }
  0x1c   :  { %2329 = vsyncadd [#allocation6], 4294967040  ;;  %vm84_vm0 = vcmask 261120   ;;  %v2439_v0 = vld [vmem:[#allocation2] sm:$0xff]  ;;  %v2441_v1 = vld [vmem:[#allocation2 + $0x8] sm:$0xff]  ;;  %v2336_v44 = vmov 0.0  }
  0x1d   :  { %v85_v2 = vsel %vm84_vm0, %v2439_v0, 0.0  ;;  %v88_v3 = vsel %vm84_vm0, %v2441_v1, 0.0  ;;  %v145_v14 = vld [vmem:[%s2723_s4 + $0x18] sm:$0xff]  ;;  %v144_v15 = vld [vmem:[%s2723_s4 + $0x10] sm:$0xff]  ;;  %v143_v16 = vld [vmem:[%s2723_s4 + $0x8] sm:$0xff]  ;;  %2087 = vmatprep.subr.mxu0 %v2336_v44  ;;  %vm2337_vm5 = vmmov 0  }
  0x1e   :  { %86 = vadd.xlane.f32.xlu0 %v85_v2  ;;  %2066 = vmatprep.subr.mxu1 %v145_v14  ;;  %v142_v17 = vld [vmem:[%s2723_s4] sm:$0xff]  ;;  %s2338_s20 = smov 96   ;;  %vm237_vm6 = vcmask 64512   ;;  %v2498_v52 = vld [vmem:[#allocation5] sm:$0xff]  ;;  %v2501_v55 = vld [vmem:[#allocation5 + $0x8] sm:$0xff]  ;;  %s2340_s21 = smov 88  }
  0x1f   :  { %2067 = vmatpush3.msra.mxu1 %v145_v14  ;;  %v1966_v34 = vld [vmem:[%s2721_s2] ss:$0 sm:$0xff]  ;;  %2089 = vmatprep.mubr.msk.f32.mxu0 %vm2337_vm5, %v2336_v44  ;;  %vm80_vm7 = vcmp.eq.f32.partialorder %v2498_v52, 0.0  ;;  %vm81_vm8 = vcmp.eq.f32.partialorder %v2501_v55, 0.0  ;;  %s2341_s22 = smov 120   ;;  %s2342_s23 = smov 56  }
  0x20   :  { %2068 = vmatprep.subr.mxu1 %v144_v15  ;;  %v1967_v37 = vld [vmem:[%s2722_s3] ss:$0 sm:$0xff]  ;;  %s2343_s24 = smov 80   ;;  %s2344_s0 = smov 112   ;;  %vm1598_vm9 = vcmask 195584   ;;  %vm1595_vm10 = vcmask 130048  }
  0x21   :  { %2069 = vmatpush3.msra.mxu1 %v144_v15  ;;  %v1968_v45 = vld [vmem:[%s2724_s5] ss:$0 sm:$0xff]  ;;  %s2339_s5 = smov 64   ;;  %s2345_s1 = smov 48   ;;  %vm1862_vm15 = vcmask 523264  }
  0x22   :  { %89 = vadd.xlane.f32.xlu0 %v88_v3  ;;  %2070 = vmatprep.subr.mxu1 %v143_v16  ;;  %s2346_s25 = smov 72   ;;  %s2347_s26 = smov 104  }
  0x23   :  { %2071 = vmatpush3.msra.mxu1 %v143_v16  ;;  %s2348_s27 = smov 40   ;;  %s2349_s28 = smov 16  }
  0x24   :  { %2072 = vmatprep.subr.mxu1 %v142_v17 }
  0x25   :  { %2073 = vmatpush3.msra.mxu1 %v142_v17 }
  0x26   :  { %2077 = vmatprep.subr.mxu1 %v2336_v44 }
  0xa7   :  { %v87_v4 = vpop.xlane.xlu0 %86 }
  0xa8   :  { %v92_v5 = vmul.f32 0.03125, %v87_v4 }
  0xaa   :  { %v94_v6 = vsub.f32 %v2439_v0, %v92_v5 }
  0xab   :  { %v90_v7 = vpop.xlane.xlu0 %89 }
  0xac   :  { %v93_v8 = vmul.f32 0.03125, %v90_v7  ;;  %v96_v9 = vmul.f32 %v94_v6, %v94_v6  ;;  %v130_v35 = vmul.f32 %v1966_v34, %v94_v6 }
  0xae   :  { %v95_v10 = vsub.f32 %v2441_v1, %v93_v8  ;;  %v98_v11 = vsel %vm84_vm0, %v96_v9, 0.0 }
  0xaf   :  { %99 = vadd.xlane.f32.xlu1 %v98_v11 }
  0xb0   :  { %v97_v12 = vmul.f32 %v95_v10, %v95_v10  ;;  %v131_v39 = vmul.f32 %v1966_v34, %v95_v10 }
  0xb2   :  { %v101_v13 = vsel %vm84_vm0, %v97_v12, 0.0 }
  0xb3   :  { %102 = vadd.xlane.f32.xlu1 %v101_v13 }
 0x138   :  { %v100_v18 = vpop.xlane.xlu1 %99 }
 0x139   :  { %v104_v19 = vmul.f32 0.032258064, %v100_v18 }
 0x13b   :  { %2218 = vrsqrt.f32 %v104_v19  ;;  %vm108_vm1 = vcmp.eq.f32.partialorder %v104_v19, inf  ;;  %v111_v24 = vand.u32 2147483648, %v104_v19  ;;  %vm110_vm2 = vcmp.eq.f32.partialorder %v104_v19, 0.0 }
 0x13c   :  { %v103_v20 = vpop.xlane.xlu1 %102 }
 0x13d   :  { %v105_v21 = vmul.f32 0.032258064, %v103_v20 }
 0x13f   :  { %2220 = vrsqrt.f32 %v105_v21  ;;  %vm115_vm3 = vcmp.eq.f32.partialorder %v105_v21, inf  ;;  %v118_v30 = vand.u32 2147483648, %v105_v21  ;;  %vm117_vm4 = vcmp.eq.f32.partialorder %v105_v21, 0.0 }
 0x148   :  { %v2219_v22 = vpop.eup %2218 }
 0x149   :  { %v107_v23 = vmul.f32 %v2219_v22, %v104_v19 }
 0x14b   :  { %v109_v25 = vsel %vm108_vm1, %v104_v19, %v107_v23 }
 0x14c   :  { %v2221_v26 = vpop.eup %2220  ;;  %v112_v27 = vsel %vm110_vm2, %v111_v24, %v109_v25 }
 0x14d   :  { %v114_v28 = vmul.f32 %v2221_v26, %v105_v21  ;;  %v120_v29 = vadd.f32 1e-06, %v112_v27 }
 0x14f   :  { %v116_v31 = vsel %vm115_vm3, %v105_v21, %v114_v28  ;;  %2222 = vrcp.f32 %v120_v29 }
 0x150   :  { %v119_v32 = vsel %vm117_vm4, %v118_v30, %v116_v31 }
 0x151   :  { %v121_v33 = vadd.f32 1e-06, %v119_v32 }
 0x153   :  { %2224 = vrcp.f32 %v121_v33 }
 0x15c   :  { %v2223_v36 = vpop.eup %2222 }
 0x15d   :  { %v132_v38 = vmul.f32 %v2223_v36, %v130_v35 }
 0x15f   :  { %v140_v40 = vadd.f32 %v1967_v37, %v132_v38 }
 0x160   :  { %v2225_v41 = vpop.eup %2224 }
 0x161   :  { %v133_v42 = vmul.f32 %v2225_v41, %v131_v39  ;;  %2074 = vmatprep.mubr.msk.f32.mxu1 %vm84_vm0, %v140_v40 }
 0x163   :  { %v141_v43 = vadd.f32 %v1967_v37, %v133_v42 }
 0x165   :  { %2075 = vmatmul.mubr.msk.f32.vlgmr.msra.gmra.mxu1 %vm84_vm0, %v141_v43 }
 0x166   :  { %2079 = vmatprep.mubr.msk.f32.mxu1 %vm2337_vm5, %v2336_v44 }
 0x225   :  { %v2076_v46 = vpop.f32.mrf.mxu1 }
 0x226   :  { %v2480_v47 = vadd.f32 %v2076_v46, %v1968_v45 }
 0x227   :  { %v225_v48 = vpop.f32.mrf.mxu1 }
 0x228   :  { %v2482_v49 = vadd.f32 %v1968_v45, %v225_v48  ;;  %313 = vrot.lane.b32.xlu1 %v2480_v47, %s2338_s20 }
 0x22a   :  { %235 = vrot.lane.b32.xlu0 %v2482_v49, %s2338_s20  ;;  %s2350_s20 = smov 24  }
 0x29a   :  { %v314_v51 = vpop.permute.xlu1 %313 }
 0x29c   :  { %v236_v50 = vpop.permute.xlu0 %235 }
 0x29d   :  { %2078 = vmatpush3.xpose.msk.msra.mxu1 %vm237_vm6, %v236_v50 }
 0x29e   :  { %2082 = vmatprep.subr.mxu1 %v2336_v44 }
 0x2a0   :  { %2080 = vmatmul.mubr.msk.f32.vlgmr.msra.gmra.mxu1 %vm237_vm6, %v2482_v49 }
 0x2a1   :  { %2083 = vmatpush3.xpose.msk.msra.mxu1 %vm237_vm6, %v314_v51  ;;  %2084 = vmatprep.mubr.msk.f32.mxu1 %vm2337_vm5, %v2336_v44 }
 0x2a2   :  { %2092 = vmatprep.subr.mxu1 %v2336_v44 }
 0x2a4   :  { %2085 = vmatmul.mubr.msk.f32.vlgmr.msra.gmra.mxu1 %vm237_vm6, %v2480_v47 }
 0x2a5   :  { %2094 = vmatprep.mubr.msk.f32.mxu1 %vm2337_vm5, %v2336_v44 }
 0x360   :  { %v308_v53 = vpop.f32.mrf.mxu1 }
 0x361   :  { %v389_v54 = vmul.f32 0.35355338, %v308_v53 }
 0x362   :  { %v2081_v56 = vpop.f32.mrf.mxu1 }
 0x363   :  { %v391_v57 = vsel %vm80_vm7, -1e+09, %v389_v54 }
 0x364   :  { %v385_v58 = vpop.f32.mrf.mxu1  ;;  %v393_v59 = vsel %vm237_vm6, %v391_v57, -inf }
 0x365   :  { %v390_v60 = vmul.f32 0.35355338, %v385_v58  ;;  %394 = vmax.xlane.f32.xlu1 %v393_v59 }
 0x366   :  { %v2086_v61 = vpop.f32.mrf.mxu1 }
 0x367   :  { %v392_v62 = vsel %vm81_vm8, -1e+09, %v390_v60 }
 0x368   :  { %v396_v63 = vsel %vm237_vm6, %v392_v62, -inf }
 0x369   :  { %397 = vmax.xlane.f32.xlu0 %v396_v63 }
 0x376   :  { %491 = vrot.lane.b32.xlu1 %v2480_v47, %s2339_s5 }
 0x37a   :  { %569 = vrot.lane.b32.xlu1 %v2482_v49, %s2340_s21 }
 0x37e   :  { %647 = vrot.lane.b32.xlu1 %v2480_v47, %s2340_s21 }
 0x3ee   :  { %v395_v2 = vpop.xlane.xlu1 %394 }
 0x3ef   :  { %v399_v3 = vsub.f32 %v391_v57, %v395_v2 }
 0x3f1   :  { %v401_v4 = vmul.f32 1.442695, %v399_v3 }
 0x3f2   :  { %v492_v5 = vpop.permute.xlu1 %491  ;;  %v398_v6 = vpop.xlane.xlu0 %397 }
 0x3f3   :  { %2226 = vpow2.f32 %v401_v4  ;;  %v400_v7 = vsub.f32 %v392_v62, %v398_v6  ;;  %2093 = vmatpush3.msra.mxu1 %v492_v5 }
 0x3f4   :  { %2102 = vmatprep.subr.mxu1 %v2336_v44 }
 0x3f5   :  { %v403_v8 = vmul.f32 1.442695, %v400_v7 }
 0x3f6   :  { %v570_v13 = vpop.permute.xlu1 %569 }
 0x3f7   :  { %2228 = vpow2.f32 %v403_v8 }
 0x3fa   :  { %v648_v14 = vpop.permute.xlu1 %647 }
 0x400   :  { %v2227_v9 = vpop.eup %2226 }
 0x401   :  { %v405_v10 = vsel %vm237_vm6, %v2227_v9, 0.0 }
 0x402   :  { %406 = vadd.xlane.f32.xlu0 %v405_v10 }
 0x404   :  { %v2229_v11 = vpop.eup %2228 }
 0x405   :  { %v408_v12 = vsel %vm237_vm6, %v2229_v11, 0.0 }
 0x406   :  { %409 = vadd.xlane.f32.xlu1 %v408_v12 }
 0x417   :  { %645 = vrot.lane.b32.xlu1 %v2480_v47, %s2341_s22 }
 0x418   :  { %415 = vrot.lane.b32.xlu0 %v2482_v49, %s2339_s5 }
 0x41c   :  { %567 = vrot.lane.b32.xlu0 %v2482_v49, %s2341_s22 }
 0x48b   :  { %v407_v15 = vpop.xlane.xlu0 %406 }
 0x48c   :  { %2230 = vrcp.f32 %v407_v15 }
 0x48f   :  { %v410_v16 = vpop.xlane.xlu1 %409  ;;  %v416_v17 = vpop.permute.xlu0 %415 }
 0x490   :  { %2232 = vrcp.f32 %v410_v16  ;;  %2088 = vmatpush3.msra.mxu0 %v416_v17 }
 0x491   :  { %2097 = vmatprep.subr.mxu0 %v2336_v44 }
 0x493   :  { %v568_v22 = vpop.permute.xlu0 %567  ;;  %v646_v23 = vpop.permute.xlu1 %645 }
 0x499   :  { %v2231_v18 = vpop.eup %2230 }
 0x49a   :  { %v413_v19 = vmul.f32 %v2231_v18, %v2227_v9 }
 0x49c   :  { %2090 = vmatmul.mubr.msk.f32.vlgmr.msra.gmra.mxu0 %vm237_vm6, %v413_v19 }
 0x49d   :  { %v2233_v20 = vpop.eup %2232  ;;  %2098 = vmatpush3.xpose.msk.msra.mxu0 %vm237_vm6, %v570_v13  ;;  %2099 = vmatprep.mubr.msk.f32.mxu0 %vm2337_vm5, %v2336_v44 }
 0x49e   :  { %v414_v21 = vmul.f32 %v2233_v20, %v2229_v11  ;;  %2107 = vmatprep.subr.mxu0 %v2336_v44 }
 0x4a0   :  { %2095 = vmatmul.mubr.msk.f32.vlgmr.msra.gmra.mxu1 %vm237_vm6, %v414_v21  ;;  %2100 = vmatmul.mubr.msk.f32.vlgmr.msra.gmra.mxu0 %vm237_vm6, %v568_v22 }
 0x4a1   :  { %2103 = vmatpush3.xpose.msk.msra.mxu1 %vm237_vm6, %v648_v14  ;;  %2104 = vmatprep.mubr.msk.f32.mxu1 %vm2337_vm5, %v2336_v44 }
 0x4a2   :  { %2112 = vmatprep.subr.mxu1 %v2336_v44  ;;  %2109 = vmatprep.mubr.msk.f32.mxu0 %vm2337_vm5, %v2336_v44 }
 0x4a4   :  { %2105 = vmatmul.mubr.msk.f32.vlgmr.msra.gmra.mxu1 %vm237_vm6, %v646_v23 }
 0x4a5   :  { %2114 = vmatprep.mubr.msk.f32.mxu1 %vm2337_vm5, %v2336_v44 }
 0x55c   :  { %v2536_v24 = vpop.f32.mrf.mxu0 }
 0x55e   :  { %v2091_v25 = vpop.f32.mrf.mxu0 }
 0x560   :  { %v2538_v26 = vpop.f32.mrf.mxu1  ;;  %v641_v27 = vpop.f32.mrf.mxu0 }
 0x561   :  { %v723_v28 = vmul.f32 0.35355338, %v641_v27 }
 0x562   :  { %v2096_v29 = vpop.f32.mrf.mxu1  ;;  %v2101_v30 = vpop.f32.mrf.mxu0 }
 0x563   :  { %v725_v31 = vsel %vm80_vm7, -1e+09, %v723_v28 }
 0x564   :  { %v719_v32 = vpop.f32.mrf.mxu1  ;;  %v727_v33 = vsel %vm237_vm6, %v725_v31, -inf }
 0x565   :  { %v724_v34 = vmul.f32 0.35355338, %v719_v32  ;;  %728 = vmax.xlane.f32.xlu0 %v727_v33 }
 0x566   :  { %v2106_v35 = vpop.f32.mrf.mxu1 }
 0x567   :  { %v726_v36 = vsel %vm81_vm8, -1e+09, %v724_v34 }
 0x568   :  { %v730_v37 = vsel %vm237_vm6, %v726_v36, -inf }
 0x569   :  { %731 = vmax.xlane.f32.xlu1 %v730_v37 }
 0x57a   :  { %825 = vrot.lane.b32.xlu1 %v2480_v47, %s2342_s23 }
 0x57b   :  { %749 = vrot.lane.b32.xlu0 %v2482_v49, %s2342_s23 }
 0x57e   :  { %903 = vrot.lane.b32.xlu1 %v2482_v49, %s2343_s24 }
 0x582   :  { %981 = vrot.lane.b32.xlu1 %v2480_v47, %s2343_s24 }
 0x586   :  { %979 = vrot.lane.b32.xlu1 %v2480_v47, %s2344_s0 }
 0x5ee   :  { %v729_v38 = vpop.xlane.xlu0 %728 }
 0x5ef   :  { %v733_v39 = vsub.f32 %v725_v31, %v729_v38 }
 0x5f1   :  { %v735_v40 = vmul.f32 1.442695, %v733_v39 }
 0x5f2   :  { %v750_v41 = vpop.permute.xlu0 %749  ;;  %v732_v42 = vpop.xlane.xlu1 %731 }
 0x5f3   :  { %2234 = vpow2.f32 %v735_v40  ;;  %v734_v43 = vsub.f32 %v726_v36, %v732_v42  ;;  %2108 = vmatpush3.msra.mxu0 %v750_v41 }
 0x5f4   :  { %2117 = vmatprep.subr.mxu0 %v2336_v44 }
 0x5f5   :  { %v737_v45 = vmul.f32 1.442695, %v734_v43 }
 0x5f6   :  { %v826_v46 = vpop.permute.xlu1 %825 }
 0x5f7   :  { %2236 = vpow2.f32 %v737_v45  ;;  %2113 = vmatpush3.msra.mxu1 %v826_v46 }
 0x5f8   :  { %2122 = vmatprep.subr.mxu1 %v2336_v44 }
 0x5fa   :  { %v904_v57 = vpop.permute.xlu1 %903 }
 0x5fe   :  { %v982_v61 = vpop.permute.xlu1 %981 }
 0x600   :  { %v2235_v48 = vpop.eup %2234 }
 0x601   :  { %v739_v50 = vsel %vm237_vm6, %v2235_v48, 0.0 }
 0x602   :  { %740 = vadd.xlane.f32.xlu0 %v739_v50  ;;  %v980_v2 = vpop.permute.xlu1 %979 }
 0x604   :  { %v2237_v51 = vpop.eup %2236 }
 0x605   :  { %v742_v53 = vsel %vm237_vm6, %v2237_v51, 0.0 }
 0x606   :  { %743 = vadd.xlane.f32.xlu0 %v742_v53 }
 0x61c   :  { %901 = vrot.lane.b32.xlu0 %v2482_v49, %s2344_s0 }
 0x68b   :  { %v741_v54 = vpop.xlane.xlu0 %740 }
 0x68c   :  { %2238 = vrcp.f32 %v741_v54 }
 0x68f   :  { %v744_v56 = vpop.xlane.xlu0 %743 }
 0x690   :  { %2240 = vrcp.f32 %v744_v56 }
 0x693   :  { %v902_v63 = vpop.permute.xlu0 %901 }
 0x699   :  { %v2239_v58 = vpop.eup %2238 }
 0x69a   :  { %v747_v59 = vmul.f32 %v2239_v58, %v2235_v48 }
 0x69c   :  { %2110 = vmatmul.mubr.msk.f32.vlgmr.msra.gmra.mxu0 %vm237_vm6, %v747_v59 }
 0x69d   :  { %v2241_v60 = vpop.eup %2240  ;;  %2118 = vmatpush3.xpose.msk.msra.mxu0 %vm237_vm6, %v904_v57  ;;  %2119 = vmatprep.mubr.msk.f32.mxu0 %vm2337_vm5, %v2336_v44 }
 0x69e   :  { %v748_v62 = vmul.f32 %v2241_v60, %v2237_v51  ;;  %2127 = vmatprep.subr.mxu0 %v2336_v44 }
 0x6a0   :  { %2115 = vmatmul.mubr.msk.f32.vlgmr.msra.gmra.mxu1 %vm237_vm6, %v748_v62  ;;  %2120 = vmatmul.mubr.msk.f32.vlgmr.msra.gmra.mxu0 %vm237_vm6, %v902_v63 }
 0x6a1   :  { %2123 = vmatpush3.xpose.msk.msra.mxu1 %vm237_vm6, %v982_v61  ;;  %2124 = vmatprep.mubr.msk.f32.mxu1 %vm2337_vm5, %v2336_v44 }
 0x6a2   :  { %2132 = vmatprep.subr.mxu1 %v2336_v44  ;;  %2129 = vmatprep.mubr.msk.f32.mxu0 %vm2337_vm5, %v2336_v44 }
 0x6a4   :  { %2125 = vmatmul.mubr.msk.f32.vlgmr.msra.gmra.mxu1 %vm237_vm6, %v980_v2 }
 0x6a5   :  { %2134 = vmatprep.mubr.msk.f32.mxu1 %vm2337_vm5, %v2336_v44 }
 0x75c   :  { %v2572_v3 = vpop.f32.mrf.mxu0 }
 0x75e   :  { %v2111_v4 = vpop.f32.mrf.mxu0 }
 0x760   :  { %v2574_v5 = vpop.f32.mrf.mxu1  ;;  %v975_v6 = vpop.f32.mrf.mxu0 }
 0x761   :  { %v1057_v7 = vmul.f32 0.35355338, %v975_v6 }
 0x762   :  { %v2116_v8 = vpop.f32.mrf.mxu1  ;;  %v2121_v9 = vpop.f32.mrf.mxu0 }
 0x763   :  { %v1059_v10 = vsel %vm80_vm7, -1e+09, %v1057_v7 }
 0x764   :  { %v1053_v11 = vpop.f32.mrf.mxu1  ;;  %v1061_v12 = vsel %vm237_vm6, %v1059_v10, -inf }
 0x765   :  { %v1058_v13 = vmul.f32 0.35355338, %v1053_v11  ;;  %1062 = vmax.xlane.f32.xlu0 %v1061_v12  ;;  %v1604_v12 = vld [vmem:[%s2725_s6 + $0x18] sm:$0xff] }
 0x766   :  { %v2126_v14 = vpop.f32.mrf.mxu1 }
 0x767   :  { %v1060_v15 = vsel %vm81_vm8, -1e+09, %v1058_v13  ;;  %v1602_v13 = vld [vmem:[%s2725_s6 + $0x8] sm:$0xff]  ;;  %v1601_v14 = vld [vmem:[%s2725_s6] sm:$0xff] }
 0x768   :  { %v1064_v16 = vsel %vm237_vm6, %v1060_v15, -inf }
 0x769   :  { %1065 = vmax.xlane.f32.xlu1 %v1064_v16 }
 0x77a   :  { %1159 = vrot.lane.b32.xlu1 %v2480_v47, %s2345_s1 }
 0x77b   :  { %1083 = vrot.lane.b32.xlu0 %v2482_v49, %s2345_s1 }
 0x77e   :  { %1237 = vrot.lane.b32.xlu1 %v2482_v49, %s2346_s25 }
 0x782   :  { %1315 = vrot.lane.b32.xlu1 %v2480_v47, %s2346_s25 }
 0x786   :  { %1313 = vrot.lane.b32.xlu1 %v2480_v47, %s2347_s26 }
 0x7ee   :  { %v1063_v17 = vpop.xlane.xlu0 %1062 }
 0x7ef   :  { %v1067_v18 = vsub.f32 %v1059_v10, %v1063_v17 }
 0x7f1   :  { %v1069_v19 = vmul.f32 1.442695, %v1067_v18 }
 0x7f2   :  { %v1084_v20 = vpop.permute.xlu0 %1083  ;;  %v1066_v21 = vpop.xlane.xlu1 %1065 }
 0x7f3   :  { %2242 = vpow2.f32 %v1069_v19  ;;  %v1068_v22 = vsub.f32 %v1060_v15, %v1066_v21  ;;  %2128 = vmatpush3.msra.mxu0 %v1084_v20 }
 0x7f4   :  { %2137 = vmatprep.subr.mxu0 %v2336_v44 }
 0x7f5   :  { %v1071_v23 = vmul.f32 1.442695, %v1068_v22 }
 0x7f6   :  { %v1160_v25 = vpop.permute.xlu1 %1159 }
 0x7f7   :  { %2244 = vpow2.f32 %v1071_v23  ;;  %2133 = vmatpush3.msra.mxu1 %v1160_v25 }
 0x7f8   :  { %2142 = vmatprep.subr.mxu1 %v2336_v44 }
 0x7fa   :  { %v1238_v33 = vpop.permute.xlu1 %1237 }
 0x7fe   :  { %v1316_v37 = vpop.permute.xlu1 %1315 }
 0x800   :  { %v2243_v27 = vpop.eup %2242 }
 0x801   :  { %v1073_v28 = vsel %vm237_vm6, %v2243_v27, 0.0 }
 0x802   :  { %1074 = vadd.xlane.f32.xlu0 %v1073_v28  ;;  %v1314_v40 = vpop.permute.xlu1 %1313 }
 0x804   :  { %v2245_v29 = vpop.eup %2244 }
 0x805   :  { %v1076_v30 = vsel %vm237_vm6, %v2245_v29, 0.0 }
 0x806   :  { %1077 = vadd.xlane.f32.xlu0 %v1076_v30 }
 0x81c   :  { %1235 = vrot.lane.b32.xlu0 %v2482_v49, %s2347_s26 }
 0x88b   :  { %v1075_v31 = vpop.xlane.xlu0 %1074 }
 0x88c   :  { %2246 = vrcp.f32 %v1075_v31 }
 0x88f   :  { %v1078_v32 = vpop.xlane.xlu0 %1077 }
 0x890   :  { %2248 = vrcp.f32 %v1078_v32 }
 0x893   :  { %v1236_v39 = vpop.permute.xlu0 %1235 }
 0x899   :  { %v2247_v34 = vpop.eup %2246 }
 0x89a   :  { %v1081_v35 = vmul.f32 %v2247_v34, %v2243_v27 }
 0x89c   :  { %2130 = vmatmul.mubr.msk.f32.vlgmr.msra.gmra.mxu0 %vm237_vm6, %v1081_v35 }
 0x89d   :  { %v2249_v36 = vpop.eup %2248  ;;  %2138 = vmatpush3.xpose.msk.msra.mxu0 %vm237_vm6, %v1238_v33  ;;  %2139 = vmatprep.mubr.msk.f32.mxu0 %vm2337_vm5, %v2336_v44  ;;  %v1995_v33 = vld [vmem:[%s2726_s7] ss:$0 sm:$0xff] }
 0x89e   :  { %v1082_v38 = vmul.f32 %v2249_v36, %v2245_v29  ;;  %2147 = vmatprep.subr.mxu0 %v2336_v44 }
 0x8a0   :  { %2135 = vmatmul.mubr.msk.f32.vlgmr.msra.gmra.mxu1 %vm237_vm6, %v1082_v38  ;;  %2140 = vmatmul.mubr.msk.f32.vlgmr.msra.gmra.mxu0 %vm237_vm6, %v1236_v39 }
 0x8a1   :  { %2143 = vmatpush3.xpose.msk.msra.mxu1 %vm237_vm6, %v1316_v37  ;;  %2144 = vmatprep.mubr.msk.f32.mxu1 %vm2337_vm5, %v2336_v44 }
 0x8a2   :  { %2152 = vmatprep.subr.mxu1 %v2336_v44  ;;  %2149 = vmatprep.mubr.msk.f32.mxu0 %vm2337_vm5, %v2336_v44 }
 0x8a4   :  { %2145 = vmatmul.mubr.msk.f32.vlgmr.msra.gmra.mxu1 %vm237_vm6, %v1314_v40 }
 0x8a5   :  { %2154 = vmatprep.mubr.msk.f32.mxu1 %vm2337_vm5, %v2336_v44 }
 0x95c   :  { %v1155_v41 = vpop.f32.mrf.mxu0 }
 0x95e   :  { %v2131_v42 = vpop.f32.mrf.mxu0 }
 0x960   :  { %v1231_v43 = vpop.f32.mrf.mxu1  ;;  %v1309_v45 = vpop.f32.mrf.mxu0 }
 0x961   :  { %v1391_v46 = vmul.f32 0.35355338, %v1309_v45 }
 0x962   :  { %v2136_v48 = vpop.f32.mrf.mxu1  ;;  %v2141_v50 = vpop.f32.mrf.mxu0 }
 0x963   :  { %v1393_v51 = vsel %vm80_vm7, -1e+09, %v1391_v46 }
 0x964   :  { %v1387_v53 = vpop.f32.mrf.mxu1  ;;  %v1395_v54 = vsel %vm237_vm6, %v1393_v51, -inf }
 0x965   :  { %v1392_v56 = vmul.f32 0.35355338, %v1387_v53  ;;  %1396 = vmax.xlane.f32.xlu0 %v1395_v54  ;;  %v1755_v53 = vld [vmem:[%s2729_s10 + $0x10] sm:$0xff]  ;;  %v1754_v54 = vld [vmem:[%s2729_s10 + $0x8] sm:$0xff] }
 0x966   :  { %v2146_v57 = vpop.f32.mrf.mxu1 }
 0x967   :  { %v1394_v58 = vsel %vm81_vm8, -1e+09, %v1392_v56  ;;  %v1753_v56 = vld [vmem:[%s2729_s10] sm:$0xff]  ;;  %v1854_v57 = vld [vmem:[%s2731_s12 + $0x38] sm:$0xff] }
 0x968   :  { %v1398_v44 = vsel %vm237_vm6, %v1394_v58, -inf }
 0x969   :  { %1399 = vmax.xlane.f32.xlu1 %v1398_v44  ;;  %v1852_v44 = vld [vmem:[%s2731_s12 + $0x28] sm:$0xff] }
 0x97a   :  { %1493 = vrot.lane.b32.xlu1 %v2480_v47, %s2348_s27 }
 0x97e   :  { %1571 = vrot.lane.b32.xlu1 %v2572_v3, %s2334_s17 }
 0x982   :  { %1573 = vrot.lane.b32.xlu1 %v2574_v5, %s2334_s17 }
 0x986   :  { %1581 = vrot.lane.b32.xlu1 %v1231_v43, %s2349_s28 }
 0x9ee   :  { %v1397_v52 = vpop.xlane.xlu0 %1396 }
 0x9ef   :  { %v1401_v59 = vsub.f32 %v1393_v51, %v1397_v52  ;;  %v1756_v51 = vld [vmem:[%s2729_s10 + $0x18] sm:$0xff]  ;;  %v1851_v52 = vld [vmem:[%s2731_s12 + $0x20] sm:$0xff] }
 0x9f1   :  { %v1403_v60 = vmul.f32 1.442695, %v1401_v59 }
 0x9f2   :  { %v1400_v61 = vpop.xlane.xlu1 %1399 }
 0x9f3   :  { %2250 = vpow2.f32 %v1403_v60  ;;  %v1402_v55 = vsub.f32 %v1394_v58, %v1400_v61  ;;  %v1853_v58 = vld [vmem:[%s2731_s12 + $0x30] sm:$0xff] }
 0x9f5   :  { %v1405_v62 = vmul.f32 1.442695, %v1402_v55 }
 0x9f6   :  { %v1494_v63 = vpop.permute.xlu1 %1493 }
 0x9f7   :  { %2252 = vpow2.f32 %v1405_v62  ;;  %2153 = vmatpush3.msra.mxu1 %v1494_v63 }
 0x9f8   :  { %2168 = vmatprep.subr.mxu1 %v1756_v51 }
 0x9fa   :  { %v1572_v19 = vpop.permute.xlu1 %1571 }
 0x9fb   :  { %v1593_v22 = vsel %vm237_vm6, %v2536_v24, %v1572_v19 }
 0x9fe   :  { %v1574_v20 = vpop.permute.xlu1 %1573 }
 0x9ff   :  { %v1594_v29 = vsel %vm237_vm6, %v2538_v26, %v1574_v20  ;;  %v1850_v20 = vld [vmem:[%s2731_s12 + $0x18] sm:$0xff] }
 0xa00   :  { %v2251_v2 = vpop.eup %2250 }
 0xa01   :  { %v1407_v47 = vsel %vm237_vm6, %v2251_v2, 0.0 }
 0xa02   :  { %1408 = vadd.xlane.f32.xlu0 %v1407_v47  ;;  %v1582_v23 = vpop.permute.xlu1 %1581 }
 0xa03   :  { %v1597_v30 = vsel %vm1595_vm10, %v1594_v29, %v1582_v23  ;;  %v1847_v23 = vld [vmem:[%s2731_s12] sm:$0xff] }
 0xa04   :  { %v2253_v3 = vpop.eup %2252 }
 0xa05   :  { %v1410_v4 = vsel %vm237_vm6, %v2253_v3, 0.0 }
 0xa06   :  { %1411 = vadd.xlane.f32.xlu0 %v1410_v4 }
 0xa1c   :  { %1417 = vrot.lane.b32.xlu0 %v2482_v49, %s2348_s27  ;;  %v1603_v49 = vld [vmem:[%s2725_s6 + $0x10] sm:$0xff] }
 0xa20   :  { %1579 = vrot.lane.b32.xlu0 %v1155_v41, %s2349_s28 }
 0xa8b   :  { %v1409_v5 = vpop.xlane.xlu0 %1408 }
 0xa8c   :  { %2254 = vrcp.f32 %v1409_v5 }
 0xa8f   :  { %v1412_v6 = vpop.xlane.xlu0 %1411 }
 0xa90   :  { %2256 = vrcp.f32 %v1412_v6 }
 0xa93   :  { %v1418_v7 = vpop.permute.xlu0 %1417 }
 0xa94   :  { %2148 = vmatpush3.msra.mxu0 %v1418_v7 }
 0xa95   :  { %2157 = vmatprep.subr.mxu0 %v1604_v12 }
 0xa97   :  { %v1580_v21 = vpop.permute.xlu0 %1579 }
 0xa98   :  { %v1596_v25 = vsel %vm1595_vm10, %v1593_v22, %v1580_v21  ;;  %v1849_v21 = vld [vmem:[%s2731_s12 + $0x10] sm:$0xff]  ;;  %v1848_v22 = vld [vmem:[%s2731_s12 + $0x8] sm:$0xff]  ;;  %s2351_s12 = smov [#allocation7]  }
 0xa99   :  { %v2255_v8 = vpop.eup %2254  ;;  %s1953_s25 = sshll.u32 %s2351_s12, 4  ;;  %s1954_s25 = int_to_ptr.vmem [resolvable:$true] %s1953_s25 }
 0xa9a   :  { %v1415_v9 = vmul.f32 %v2255_v8, %v2251_v2  ;;  %p2311_p11 = scmp.lt.s32.totalorder %s1954_s25, %s1954_s25 }
 0xa9c   :  { %2150 = vmatmul.mubr.msk.f32.vlgmr.msra.gmra.mxu0 %vm237_vm6, %v1415_v9 }
 0xa9d   :  { %v2257_v10 = vpop.eup %2256  ;;  %2158 = vmatpush3.msra.mxu0 %v1604_v12 }
 0xa9e   :  { %v1416_v11 = vmul.f32 %v2257_v10, %v2253_v3  ;;  %2159 = vmatprep.subr.mxu0 %v1603_v49 }
 0xa9f   :  { %2160 = vmatpush3.msra.mxu0 %v1603_v49 }
 0xaa0   :  { %2155 = vmatmul.mubr.msk.f32.vlgmr.msra.gmra.mxu1 %vm237_vm6, %v1416_v11  ;;  %2161 = vmatprep.subr.mxu0 %v1602_v13  ;;  %v1998_v11 = vld [vmem:[%s2727_s8] ss:$0 sm:$0xff] }
 0xaa1   :  { %2162 = vmatpush3.msra.mxu0 %v1602_v13  ;;  %2169 = vmatpush3.msra.mxu1 %v1756_v51  ;;  %v1999_v13 = vld [vmem:[%s2728_s9] ss:$0 sm:$0xff] }
 0xaa2   :  { %2163 = vmatprep.subr.mxu0 %v1601_v14  ;;  %2170 = vmatprep.subr.mxu1 %v1755_v53 }
 0xaa3   :  { %2164 = vmatpush3.msra.mxu0 %v1601_v14  ;;  %2171 = vmatpush3.msra.mxu1 %v1755_v53 }
 0xaa4   :  { %2172 = vmatprep.subr.mxu1 %v1754_v54  ;;  %2179 = vmatprep.subr.mxu0 %v1854_v57 }
 0xaa5   :  { %2173 = vmatpush3.msra.mxu1 %v1754_v54 }
 0xaa6   :  { %2174 = vmatprep.subr.mxu1 %v1753_v56 }
 0xaa7   :  { %2175 = vmatpush3.msra.mxu1 %v1753_v56 }
 0xb5c   :  { %v1489_v15 = vpop.f32.mrf.mxu0 }
 0xb5d   :  { %1587 = vrot.lane.b32.xlu0 %v1489_v15, %s2350_s20 }
 0xb5e   :  { %v2151_v16 = vpop.f32.mrf.mxu0 }
 0xb60   :  { %v1565_v17 = vpop.f32.mrf.mxu1 }
 0xb61   :  { %1589 = vrot.lane.b32.xlu1 %v1565_v17, %s2350_s20 }
 0xb62   :  { %v2156_v18 = vpop.f32.mrf.mxu1 }
 0xbcf   :  { %v1588_v27 = vpop.permute.xlu0 %1587 }
 0xbd0   :  { %v1599_v28 = vsel %vm1598_vm9, %v1596_v25, %v1588_v27  ;;  %v2000_v25 = vld [vmem:[%s2730_s11] ss:$0 sm:$0xff]  ;;  %s2306_s11 = scalar_lea.vmem %s1954_s25, 256 }
 0xbd1   :  { %2165 = vmatprep.mubr.msk.f32.mxu0 %vm84_vm0, %v1599_v28  ;;  %p2307_p10 = scmp.ne.s32.totalorder %s1954_s25, %s2306_s11  ;;  %p2312_p12 = scmp.lt.s32.totalorder %s2306_s11, %s2306_s11 }
 0xbd3   :  { %v1590_v31 = vpop.permute.xlu1 %1589  ;;  %p2313_p13 = por %p2312_p12, %p2311_p11 }
 0xbd4   :  { %v1600_v32 = vsel %vm1598_vm9, %v1597_v30, %v1590_v31 }
 0xbd5   :  { %2166 = vmatmul.mubr.msk.f32.vlgmr.msra.gmra.mxu0 %vm84_vm0, %v1600_v32  ;;  %p2314_p0 = pnand %p2313_p13, %p2307_p10 }
 0xbd6   :  { %2180 = vmatpush3.msra.mxu0 %v1854_v57 }
 0xbd7   :  { %2181 = vmatprep.subr.mxu0 %v1853_v58 }
 0xbd8   :  { %2182 = vmatpush3.msra.mxu0 %v1853_v58 }
 0xbd9   :  { %2183 = vmatprep.subr.mxu0 %v1852_v44 }
 0xbda   :  { %2184 = vmatpush3.msra.mxu0 %v1852_v44 }
 0xbdb   :  { %2185 = vmatprep.subr.mxu0 %v1851_v52 }
 0xbdc   :  { %2186 = vmatpush3.msra.mxu0 %v1851_v52 }
 0xbdd   :  { %2187 = vmatprep.subr.mxu0 %v1850_v20 }
 0xbde   :  { %2188 = vmatpush3.msra.mxu0 %v1850_v20 }
 0xbdf   :  { %2189 = vmatprep.subr.mxu0 %v1849_v21 }
 0xbe0   :  { %2190 = vmatpush3.msra.mxu0 %v1849_v21 }
 0xbe1   :  { %2191 = vmatprep.subr.mxu0 %v1848_v22 }
 0xbe2   :  { %2192 = vmatpush3.msra.mxu0 %v1848_v22 }
 0xbe3   :  { %2193 = vmatprep.subr.mxu0 %v1847_v23 }
 0xbe4   :  { %2194 = vmatpush3.msra.mxu0 %v1847_v23 }
 0xc95   :  { %v2167_v24 = vpop.f32.mrf.mxu0 }
 0xc96   :  { %v1690_v34 = vadd.f32 %v2167_v24, %v1995_v33 }
 0xc97   :  { %v1684_v35 = vpop.f32.mrf.mxu0 }
 0xc98   :  { %v2646_v36 = vadd.f32 %v1690_v34, %v2441_v1  ;;  %v1685_v37 = vadd.f32 %v1995_v33, %v1684_v35  ;;  %v2003_v33 = vld [vmem:[%s2732_s13] ss:$0 sm:$0xff] }
 0xc9a   :  { %v2649_v38 = vadd.f32 %v1685_v37, %v2439_v0  ;;  %v1700_v26 = vsel %vm84_vm0, %v2646_v36, 0.0 }
 0xc9b   :  { %1701 = vadd.xlane.f32.xlu1 %v1700_v26 }
 0xc9c   :  { %v1697_v39 = vsel %vm84_vm0, %v2649_v38, 0.0 }
 0xc9d   :  { %1698 = vadd.xlane.f32.xlu0 %v1697_v39 }
 0xd24   :  { %v1702_v40 = vpop.xlane.xlu1 %1701 }
 0xd25   :  { %v1704_v41 = vmul.f32 0.03125, %v1702_v40 }
 0xd26   :  { %v1699_v42 = vpop.xlane.xlu0 %1698 }
 0xd27   :  { %v1703_v43 = vmul.f32 0.03125, %v1699_v42  ;;  %v1706_v45 = vsub.f32 %v2646_v36, %v1704_v41 }
 0xd29   :  { %v1705_v1 = vsub.f32 %v2649_v38, %v1703_v43  ;;  %v1708_v48 = vmul.f32 %v1706_v45, %v1706_v45  ;;  %v1742_v15 = vmul.f32 %v1998_v11, %v1706_v45 }
 0xd2b   :  { %v1707_v46 = vmul.f32 %v1705_v1, %v1705_v1  ;;  %v1712_v50 = vsel %vm84_vm0, %v1708_v48, 0.0  ;;  %v1741_v12 = vmul.f32 %v1998_v11, %v1705_v1 }
 0xd2d   :  { %v1709_v0 = vsel %vm84_vm0, %v1707_v46, 0.0 }
 0xd2e   :  { %1710 = vadd.xlane.f32.xlu0 %v1709_v0 }
 0xd32   :  { %1713 = vadd.xlane.f32.xlu0 %v1712_v50 }
 0xdb7   :  { %v1711_v59 = vpop.xlane.xlu0 %1710 }
 0xdb8   :  { %v1715_v60 = vmul.f32 0.032258064, %v1711_v59 }
 0xdba   :  { %2258 = vrsqrt.f32 %v1715_v60  ;;  %vm1719_vm11 = vcmp.eq.f32.partialorder %v1715_v60, inf  ;;  %v1722_v2 = vand.u32 2147483648, %v1715_v60  ;;  %vm1721_vm12 = vcmp.eq.f32.partialorder %v1715_v60, 0.0 }
 0xdbb   :  { %v1714_v61 = vpop.xlane.xlu0 %1713 }
 0xdbc   :  { %v1716_v55 = vmul.f32 0.032258064, %v1714_v61 }
 0xdbe   :  { %2260 = vrsqrt.f32 %v1716_v55  ;;  %vm1726_vm13 = vcmp.eq.f32.partialorder %v1716_v55, inf  ;;  %v1729_v7 = vand.u32 2147483648, %v1716_v55  ;;  %vm1728_vm14 = vcmp.eq.f32.partialorder %v1716_v55, 0.0 }
 0xdc7   :  { %v2259_v62 = vpop.eup %2258 }
 0xdc8   :  { %v1718_v63 = vmul.f32 %v2259_v62, %v1715_v60 }
 0xdca   :  { %v1720_v47 = vsel %vm1719_vm11, %v1715_v60, %v1718_v63 }
 0xdcb   :  { %v2261_v3 = vpop.eup %2260  ;;  %v1723_v4 = vsel %vm1721_vm12, %v1722_v2, %v1720_v47 }
 0xdcc   :  { %v1731_v5 = vadd.f32 1e-06, %v1723_v4  ;;  %v1725_v6 = vmul.f32 %v2261_v3, %v1716_v55 }
 0xdce   :  { %2262 = vrcp.f32 %v1731_v5  ;;  %v1727_v8 = vsel %vm1726_vm13, %v1716_v55, %v1725_v6 }
 0xdcf   :  { %v1730_v9 = vsel %vm1728_vm14, %v1729_v7, %v1727_v8 }
 0xdd0   :  { %v1732_v10 = vadd.f32 1e-06, %v1730_v9 }
 0xdd2   :  { %2264 = vrcp.f32 %v1732_v10 }
 0xddb   :  { %v2263_v49 = vpop.eup %2262 }
 0xddc   :  { %v1743_v14 = vmul.f32 %v2263_v49, %v1741_v12 }
 0xdde   :  { %v1751_v16 = vadd.f32 %v1999_v13, %v1743_v14 }
 0xddf   :  { %v2265_v17 = vpop.eup %2264 }
 0xde0   :  { %v1744_v18 = vmul.f32 %v2265_v17, %v1742_v15  ;;  %2176 = vmatprep.mubr.msk.f32.mxu1 %vm84_vm0, %v1751_v16 }
 0xde2   :  { %v1752_v19 = vadd.f32 %v1999_v13, %v1744_v18 }
 0xde4   :  { %2177 = vmatmul.mubr.msk.f32.vlgmr.msra.gmra.mxu1 %vm84_vm0, %v1752_v19 }
 0xea4   :  { %v2178_v27 = vpop.f32.mrf.mxu1 }
 0xea5   :  { %v1842_v28 = vadd.f32 %v2178_v27, %v2000_v25 }
 0xea6   :  { %v1836_v29 = vpop.f32.mrf.mxu1 }
 0xea7   :  { %v1837_v30 = vadd.f32 %v2000_v25, %v1836_v29  ;;  %v1846_v32 = vmax.f32 %v1842_v28, 0.0 }
 0xea9   :  { %v1845_v31 = vmax.f32 %v1837_v30, 0.0 }
 0xeab   :  { %2195 = vmatprep.mubr.msk.f32.mxu0 %vm1862_vm15, %v1845_v31 }
 0xeac   :  { %2196 = vmatmul.mubr.msk.f32.vlgmr.msra.gmra.mxu0 %vm1862_vm15, %v1846_v32 }
 0xf6c   :  { %v2197_v24 = vpop.f32.mrf.mxu0 }
 0xf6d   :  { %v1941_v34 = vadd.f32 %v2197_v24, %v2003_v33 }
 0xf6e   :  { %v1935_v35 = vpop.f32.mrf.mxu0 }
 0xf6f   :  { %v1945_v37 = vadd.f32 %v1941_v34, %v2646_v36  ;;  %v1936_v26 = vadd.f32 %v2003_v33, %v1935_v35 }
 0xf71   :  { %1947 = vst.msk [vmem:[#allocation7 + $0x8] sm:$0xff] %vm84_vm0, %v1945_v37  ;;  %v1944_v39 = vadd.f32 %v1936_v26, %v2649_v38 }
 0xf73   :  { %1946 = vst.msk [vmem:[#allocation7] sm:$0xff] %vm84_vm0, %v1944_v39 }
 0xf74   :  { %2317 = shalt.err (!%p2314_p0)
}
 0xf75   :  { %1959 = dma.vmem_to_hbm [thread:$0]  %s1954_s25, 256, %s2733_s14, [#allocation4], %s2333_s16, %s2333_s16, %s2334_s17  }
 0xf76   :  { %2330 = dma.done.wait [#allocation4], 256  }
 0xf77   :  { %2331 = vsyncadd [#allocation4], 4294967040 }
 0xf78   :  { %1963 = vsyncpa [#allocation3], 1 }
 0xf79   :  { %1964 = vsyncpa [#allocation6], 1 }
 0xf7a   :  { %1965 = vsyncpa [#allocation4], 1 }

</bundles_post_ra>
